<compile_context>
chip_gen: v6e
topology: v6e:2x2x1
jax: 0.10.0
libtpu: 0.0.40
codegen_flags: <defaults>
</compile_context>

<pallas_src>
import jax
import jax.numpy as jnp
from jax.experimental import pallas as pl
from jax.experimental.pallas import tpu as pltpu


def decoder_kernel(x_ref, w1_ref, b1_ref, w2_ref, b2_ref, w3_ref, b3_ref, o_ref):
    # x / weights are bf16 (MXU operands); accumulate + epilogue in f32.
    x = x_ref[...]

    # linear1 + ReLU
    h1 = jnp.dot(x, w1_ref[...], preferred_element_type=jnp.float32) + b1_ref[...]
    h1 = jnp.maximum(h1, 0.0)

    # linear2 + ReLU
    h2 = jnp.dot(h1.astype(jnp.bfloat16), w2_ref[...],
                 preferred_element_type=jnp.float32) + b2_ref[...]
    h2 = jnp.maximum(h2, 0.0)

    # linear3 + sigmoid (f32 epilogue; exp runs on the EUP slot)
    logits = jnp.dot(h2.astype(jnp.bfloat16), w3_ref[...],
                     preferred_element_type=jnp.float32) + b3_ref[...]
    o_ref[...] = jax.nn.sigmoid(logits)


def decoder_forward(x, params, *, block_b=32):
    """x: [B, noise_dim] f32. Returns x_re: [B, input_dim] f32."""
    B, noise_dim = x.shape
    hidden_dim = params["w1"].shape[1]
    input_dim = params["w3"].shape[1]

    tb = min(block_b, B)
    grid = (pl.cdiv(B, tb),)

    # bf16 MXU operands, f32 biases (added to the f32 accumulator).
    xb = x.astype(jnp.bfloat16)
    w1 = params["w1"].astype(jnp.bfloat16)
    w2 = params["w2"].astype(jnp.bfloat16)
    w3 = params["w3"].astype(jnp.bfloat16)
    b1, b2, b3 = params["b1"], params["b2"], params["b3"]

    batch_spec = lambda shape: pl.BlockSpec(shape, lambda i: (i, 0))
    const_spec = lambda shape: pl.BlockSpec(shape, lambda i: (0, 0))

    grid_spec = pltpu.PrefetchScalarGridSpec(
        num_scalar_prefetch=0,
        grid=grid,
        in_specs=[
            batch_spec((tb, noise_dim)),          # x block walks the batch
            const_spec((noise_dim, hidden_dim)),  # weights/biases VMEM-resident
            const_spec((1, hidden_dim)),
            const_spec((hidden_dim, hidden_dim)),
            const_spec((1, hidden_dim)),
            const_spec((hidden_dim, input_dim)),
            const_spec((1, input_dim)),
        ],
        out_specs=batch_spec((tb, input_dim)),
    )

    return pl.pallas_call(
        decoder_kernel,
        out_shape=jax.ShapeDtypeStruct((B, input_dim), jnp.float32),
        grid_spec=grid_spec,
        compiler_params=pltpu.CompilerParams(
            dimension_semantics=("parallel",),   # v7x: shard batch over 2 TCs
        ),
    )(xb, w1, b1, w2, b2, w3, b3)


def init_params(key, input_dim, noise_dim, hidden_dim=128):
    """Mimic PyTorch nn.Linear default init: U(-1/sqrt(fan_in), +1/sqrt(fan_in))."""
    def linear(k, fan_in, fan_out):
        kw, kb = jax.random.split(k)
        bound = 1.0 / jnp.sqrt(jnp.float32(fan_in))
        w = jax.random.uniform(kw, (fan_in, fan_out), jnp.float32, -bound, bound)
        b = jax.random.uniform(kb, (1, fan_out), jnp.float32, -bound, bound)
        return w, b

    k1, k2, k3 = jax.random.split(key, 3)
    w1, b1 = linear(k1, noise_dim, hidden_dim)
    w2, b2 = linear(k2, hidden_dim, hidden_dim)
    w3, b3 = linear(k3, hidden_dim, input_dim)
    return {"w1": w1, "b1": b1, "w2": w2, "b2": b2, "w3": w3, "b3": b3}


def decoder_ref(x, params, *, bf16=True):
    """Plain-JAX reference. With bf16=True it mirrors the kernel's MXU dtypes."""
    cast = (lambda a: a.astype(jnp.bfloat16)) if bf16 else (lambda a: a)
    h1 = jnp.maximum(
        jnp.dot(cast(x), cast(params["w1"]),
                preferred_element_type=jnp.float32) + params["b1"], 0.0)
    h2 = jnp.maximum(
        jnp.dot(cast(h1), cast(params["w2"]),
                preferred_element_type=jnp.float32) + params["b2"], 0.0)
    logits = jnp.dot(cast(h2), cast(params["w3"]),
                     preferred_element_type=jnp.float32) + params["b3"]
    return jax.nn.sigmoid(logits)


if __name__ == "__main__":
    # Small shapes consistent with the module: latent -> 128 hidden -> 256-dim output.
    B, noise_dim, hidden_dim, input_dim = 64, 16, 128, 256

    key = jax.random.PRNGKey(0)
    k_params, k_x = jax.random.split(key)

    params = init_params(k_params, input_dim, noise_dim, hidden_dim)
    x = jax.random.normal(k_x, (B, noise_dim), jnp.float32)

    x_re = decoder_forward(x, params, block_b=32)
    jax.block_until_ready(x_re)

    # Reference with the same bf16 MXU-operand casting (tight tolerance) ...
    ref_bf16 = decoder_ref(x, params, bf16=True)
    # ... and the pure-f32 PyTorch-equivalent math (loose tolerance, bf16 rounding).
    ref_f32 = decoder_ref(x, params, bf16=False)

    assert x_re.shape == (B, input_dim)
    assert bool(jnp.all(jnp.isfinite(x_re)))
    assert jnp.allclose(x_re, ref_bf16, atol=1e-3), float(jnp.max(jnp.abs(x_re - ref_bf16)))
    assert jnp.allclose(x_re, ref_f32, atol=3e-2), float(jnp.max(jnp.abs(x_re - ref_f32)))

    print("KERNEL_OK")
</pallas_src>

<mosaic_0001>
module attributes {stable_mosaic.version = 11 : i64} {
  func.func @decoder_kernel(%arg0: i32, %arg1: memref<32x16xbf16, #tpu.memory_space<vmem>>, %arg2: memref<16x128xbf16, #tpu.memory_space<vmem>>, %arg3: memref<1x128xf32, #tpu.memory_space<vmem>>, %arg4: memref<128x128xbf16, #tpu.memory_space<vmem>>, %arg5: memref<1x128xf32, #tpu.memory_space<vmem>>, %arg6: memref<128x256xbf16, #tpu.memory_space<vmem>>, %arg7: memref<1x256xf32, #tpu.memory_space<vmem>>, %arg8: memref<32x256xf32, #tpu.memory_space<vmem>>) attributes {dimension_semantics = [#tpu.dimension_semantics<parallel>], iteration_bounds = array<i64: 2>, scalar_prefetch = 0 : i64, scratch_operands = 0 : i64, tpu.core_type = #tpu.core_type<tc>, window_params = [{transform_indices = @transform_0, window_bounds = array<i64: 32, 16>}, {pipeline_mode = #tpu.pipeline_mode<synchronous>, transform_indices = @transform_1, window_bounds = array<i64: 16, 128>}, {pipeline_mode = #tpu.pipeline_mode<synchronous>, transform_indices = @transform_2, window_bounds = array<i64: 1, 128>}, {pipeline_mode = #tpu.pipeline_mode<synchronous>, transform_indices = @transform_3, window_bounds = array<i64: 128, 128>}, {pipeline_mode = #tpu.pipeline_mode<synchronous>, transform_indices = @transform_4, window_bounds = array<i64: 1, 128>}, {pipeline_mode = #tpu.pipeline_mode<synchronous>, transform_indices = @transform_5, window_bounds = array<i64: 128, 256>}, {pipeline_mode = #tpu.pipeline_mode<synchronous>, transform_indices = @transform_6, window_bounds = array<i64: 1, 256>}, {transform_indices = @transform_7, window_bounds = array<i64: 32, 256>}]} {
    %c0 = arith.constant 0 : index
    %c0_0 = arith.constant 0 : index
    %0 = vector.load %arg1[%c0, %c0_0] : memref<32x16xbf16, #tpu.memory_space<vmem>>, vector<32x16xbf16>
    %c0_1 = arith.constant 0 : index
    %c0_2 = arith.constant 0 : index
    %1 = vector.load %arg2[%c0_1, %c0_2] : memref<16x128xbf16, #tpu.memory_space<vmem>>, vector<16x128xbf16>
    %cst = arith.constant dense<0.000000e+00> : vector<32x128xf32>
    %2 = tpu.matmul %0, %1, %cst {dimension_numbers = #tpu.dot_dimension_numbers<[1], [0], [0], [1], [0, 0, 1, 1], [], []>} : vector<32x16xbf16>, vector<16x128xbf16>, vector<32x128xf32> -> vector<32x128xf32>
    %c0_3 = arith.constant 0 : index
    %c0_4 = arith.constant 0 : index
    %3 = vector.load %arg3[%c0_3, %c0_4] : memref<1x128xf32, #tpu.memory_space<vmem>>, vector<1x128xf32>
    %4 = vector.broadcast %3 : vector<1x128xf32> to vector<32x128xf32>
    %5 = arith.addf %2, %4 : vector<32x128xf32>
    %cst_5 = arith.constant 0.000000e+00 : f32
    %6 = vector.broadcast %cst_5 : f32 to vector<32x128xf32>
    %7 = arith.maximumf %5, %6 : vector<32x128xf32>
    %8 = arith.truncf %7 : vector<32x128xf32> to vector<32x128xbf16>
    %c0_6 = arith.constant 0 : index
    %c0_7 = arith.constant 0 : index
    %9 = vector.load %arg4[%c0_6, %c0_7] : memref<128x128xbf16, #tpu.memory_space<vmem>>, vector<128x128xbf16>
    %cst_8 = arith.constant dense<0.000000e+00> : vector<32x128xf32>
    %10 = tpu.matmul %8, %9, %cst_8 {dimension_numbers = #tpu.dot_dimension_numbers<[1], [0], [0], [1], [0, 0, 1, 1], [], []>} : vector<32x128xbf16>, vector<128x128xbf16>, vector<32x128xf32> -> vector<32x128xf32>
    %c0_9 = arith.constant 0 : index
    %c0_10 = arith.constant 0 : index
    %11 = vector.load %arg5[%c0_9, %c0_10] : memref<1x128xf32, #tpu.memory_space<vmem>>, vector<1x128xf32>
    %12 = vector.broadcast %11 : vector<1x128xf32> to vector<32x128xf32>
    %13 = arith.addf %10, %12 : vector<32x128xf32>
    %cst_11 = arith.constant 0.000000e+00 : f32
    %14 = vector.broadcast %cst_11 : f32 to vector<32x128xf32>
    %15 = arith.maximumf %13, %14 : vector<32x128xf32>
    %16 = arith.truncf %15 : vector<32x128xf32> to vector<32x128xbf16>
    %c0_12 = arith.constant 0 : index
    %c0_13 = arith.constant 0 : index
    %17 = vector.load %arg6[%c0_12, %c0_13] : memref<128x256xbf16, #tpu.memory_space<vmem>>, vector<128x256xbf16>
    %cst_14 = arith.constant dense<0.000000e+00> : vector<32x256xf32>
    %18 = tpu.matmul %16, %17, %cst_14 {dimension_numbers = #tpu.dot_dimension_numbers<[1], [0], [0], [1], [0, 0, 1, 1], [], []>} : vector<32x128xbf16>, vector<128x256xbf16>, vector<32x256xf32> -> vector<32x256xf32>
    %c0_15 = arith.constant 0 : index
    %c0_16 = arith.constant 0 : index
    %19 = vector.load %arg7[%c0_15, %c0_16] : memref<1x256xf32, #tpu.memory_space<vmem>>, vector<1x256xf32>
    %20 = vector.broadcast %19 : vector<1x256xf32> to vector<32x256xf32>
    %21 = arith.addf %18, %20 : vector<32x256xf32>
    %22 = arith.negf %21 : vector<32x256xf32>
    %23 = math.exp %22 : vector<32x256xf32>
    %cst_17 = arith.constant 1.000000e+00 : f32
    %24 = vector.broadcast %cst_17 : f32 to vector<32x256xf32>
    %25 = arith.addf %24, %23 : vector<32x256xf32>
    %26 = arith.divf %24, %25 : vector<32x256xf32>
    %c0_18 = arith.constant 0 : index
    %c0_19 = arith.constant 0 : index
    %27 = vector.load %arg8[%c0_18, %c0_19] : memref<32x256xf32, #tpu.memory_space<vmem>>, vector<32x256xf32>
    tpu.vector_store %arg8[%c0_18, %c0_19], %26 {strides = array<i32>} : memref<32x256xf32, #tpu.memory_space<vmem>>, vector<32x256xf32>,
    return
  }
  func.func @transform_0(%arg0: i32) -> (i32, i32) {
    %c0_i32 = arith.constant 0 : i32
    %c0_i32_0 = arith.constant 0 : i32
    return %arg0, %c0_i32 : i32, i32
  }
  func.func @transform_1(%arg0: i32) -> (i32, i32) {
    %c0_i32 = arith.constant 0 : i32
    %c0_i32_0 = arith.constant 0 : i32
    %c0_i32_1 = arith.constant 0 : i32
    return %c0_i32, %c0_i32_0 : i32, i32
  }
  func.func @transform_2(%arg0: i32) -> (i32, i32) {
    %c0_i32 = arith.constant 0 : i32
    %c0_i32_0 = arith.constant 0 : i32
    %c0_i32_1 = arith.constant 0 : i32
    return %c0_i32, %c0_i32_0 : i32, i32
  }
  func.func @transform_3(%arg0: i32) -> (i32, i32) {
    %c0_i32 = arith.constant 0 : i32
    %c0_i32_0 = arith.constant 0 : i32
    %c0_i32_1 = arith.constant 0 : i32
    return %c0_i32, %c0_i32_0 : i32, i32
  }
  func.func @transform_4(%arg0: i32) -> (i32, i32) {
    %c0_i32 = arith.constant 0 : i32
    %c0_i32_0 = arith.constant 0 : i32
    %c0_i32_1 = arith.constant 0 : i32
    return %c0_i32, %c0_i32_0 : i32, i32
  }
  func.func @transform_5(%arg0: i32) -> (i32, i32) {
    %c0_i32 = arith.constant 0 : i32
    %c0_i32_0 = arith.constant 0 : i32
    %c0_i32_1 = arith.constant 0 : i32
    return %c0_i32, %c0_i32_0 : i32, i32
  }
  func.func @transform_6(%arg0: i32) -> (i32, i32) {
    %c0_i32 = arith.constant 0 : i32
    %c0_i32_0 = arith.constant 0 : i32
    %c0_i32_1 = arith.constant 0 : i32
    return %c0_i32, %c0_i32_0 : i32, i32
  }
  func.func @transform_7(%arg0: i32) -> (i32, i32) {
    %c0_i32 = arith.constant 0 : i32
    %c0_i32_0 = arith.constant 0 : i32
    return %arg0, %c0_i32 : i32, i32
  }
}

</mosaic_0001>

<bundles_post_ra>
// kernel: tpu_custom_call.1
= control target key start
LH: loop header
LB: loop body
LE: loop exit
PB: predicated region body
PF: predicated region fallthrough
CT: control target
= control target key end

     0   :  { %12 = vsyncpa [#allocation3], 0  ;;  %s1405_s0 = inlined_call_operand.vmem [shape: bf16[64,16], index: 0, kind: input, shape index: {}]   ;;  %s1406_s1 = inlined_call_operand.vmem [shape: bf16[16,128], index: 1, kind: input, shape index: {}]   ;;  %s1407_s2 = inlined_call_operand.vmem [shape: f32[1,128], index: 2, kind: input, shape index: {}]   ;;  %s1408_s3 = inlined_call_operand.hbm [shape: bf16[128,128], index: 3, kind: input, shape index: {}]   ;;  %s1409_s4 = inlined_call_operand.vmem [shape: f32[1,128], index: 4, kind: input, shape index: {}]   ;;  %s1410_s5 = inlined_call_operand.hbm [shape: bf16[128,256], index: 5, kind: input, shape index: {}]   ;;  %s1411_s6 = inlined_call_operand.vmem [shape: f32[1,256], index: 6, kind: input, shape index: {}]   ;;  %s1412_s7 = inlined_call_operand.hbm [shape: f32[64,256], index: 7, kind: output, shape index: {}]  }
   0x1   :  { %13 = vsyncpa [#allocation6], 0 }
   0x2   :  { %14 = vsyncpa [#allocation4], 0 }
   0x3   :  { %16 = vsyncpa [#allocation4 + $0x1], 0  ;;  %s1247_s24 = smov 0   ;;  %s1249_s25 = smov 0  }
   0x4   :  { %s1251_s26 = smov 0   ;;  %s1253_s27 = smov 0  }
   0x5 LB: > { %s1268_s28 = sadd.s32 4294967295, %s1195_s27   ;;  %s844_s29 = sadd.s32 4294967294, %s1195_s27   ;;  %s1195_s27 = sphi %s1253_s27, %s1426_s27   ;;  %s1191_s26 = sphi %s1251_s26, %s1425_s26   ;;  %s1187_s25 = sphi %s1249_s25, %s1424_s25   ;;  %s1183_s24 = sphi %s1247_s24, %s1423_s24  }
   0x6   : > { %s1272_s30 = sadd.s32 1, %s1195_s27   ;;  %s181_s8 = sadd.s32 1, %s1191_s26 }
   0x7   : > { %s178_s9 = ssub.s32 %s1195_s27, %s1272_s30  ;;  %p191_p0 = scmp.ne.s32.totalorder %s1191_s26, %s1187_s25 }
   0x8   : > { %p179_p1 = scmp.eq.s32.totalorder %s178_s9, 0  ;;  %p192_p2 = scmp.eq.s32.totalorder %s1268_s28, 1 }
   0x9   : > { %p197_p3 = scmp.ne.s32.totalorder %s1187_s25, %s1183_s24  ;;  %p198_p4 = scmp.eq.s32.totalorder %s844_s29, 1 }
   0xa   : > { %s1283_s10 = scalar_select %p179_p1, %s1191_s26, %s181_s8  }
   0xb   : > { %p1285_p5 = por %p192_p2, %p191_p0  ;;  %p1289_p6 = por %p198_p4, %p197_p3 }
   0xc   : > { %p845_p7 = scmp.ge.s32.totalorder %s1195_s27, 1  ;;  %p205_p8 = scmp.lt.s32.totalorder %s1195_s27, 3 }
   0xd   : > { %s1415_s12 = scalar_select %p1289_p6, 1, 0 }
   0xe   : > { %p1413_p9 = scmp.eq.s32.totalorder %s1268_s28, 0  ;;  %p1296_p10 = pnand %p845_p7, %p205_p8 }
   0xf   : > { %s1197_s14 = smov [#allocation2]   ;;  %s1198_s17 = smov [#allocation5]  }
  0x10   : > { %s223_s15 = sshll.u32 %s1197_s14, 4  ;;  %p951_p11 = pneg %p1296_p10  ;;  %s224_s15 = int_to_ptr.vmem [resolvable:$true] %s223_s15 }
  0x11   : > { %s239_s18 = sshll.u32 %s1198_s17, 4  ;;  %s1086_s19 = scalar_lea.vmem %s224_s15, 1024  ;;  %s240_s18 = int_to_ptr.vmem [resolvable:$true] %s239_s18 }
  0x12   : > { %p1304_p12 = pnand %p1413_p9, %p951_p11  ;;  %p1087_p0 = scmp.ne.s32.totalorder %s224_s15, %s1086_s19 }
  0x13   : > { %p1094_p3 = scmp.lt.s32.totalorder %s224_s15, %s224_s15  ;;  %p1095_p4 = scmp.lt.s32.totalorder %s1086_s19, %s1086_s19 }
  0x14   : > { %p1077_p13 = pneg %p1304_p12 }
  0x15   : > { %p1096_p7 = por %p1095_p4, %p1094_p3 }
  0x16   : > { %p1089_p1 = pnand %p1087_p0, %p1077_p13 }
  0x18   : > { %p1090_p2 = pneg %p1089_p1 }
  0x1a   : > { %p1097_p8 = pnand %p1096_p7, %p1090_p2 }
  0x1c   : > { %1100 = shalt.err (!%p1097_p8)
}
  0x1d   : > { %s1199_s20 = smov 64   ;;  %s1200_s21 = smov 4  }
  0x1e   : > { %954 = dma.hbm_to_vmem [thread:$0]  (!%p1304_p12), %s1408_s3, 1024, %s224_s15, [#allocation3], %s1199_s20, %s1199_s20, %s1200_s21  }
  0x1f   : > { %s1112_s29 = scalar_lea.vmem %s240_s18, 2048  ;;  %p1120_p9 = scmp.lt.s32.totalorder %s240_s18, %s240_s18 }
  0x20   : > { %p1113_p11 = scmp.ne.s32.totalorder %s240_s18, %s1112_s29  ;;  %p1121_p6 = scmp.lt.s32.totalorder %s1112_s29, %s1112_s29 }
  0x22   : > { %p1115_p0 = pnand %p1113_p11, %p1077_p13  ;;  %p1122_p3 = por %p1121_p6, %p1120_p9 }
  0x24   : > { %p1116_p1 = pneg %p1115_p0 }
  0x26   : > { %p1123_p2 = pnand %p1122_p3, %p1116_p1 }
  0x28   : > { %1126 = shalt.err (!%p1123_p2)
}
  0x29   : > { %s1201_s8 = smov 128   ;;  %s1202_s9 = smov 8  }
  0x2a   : > { %957 = dma.hbm_to_vmem [thread:$0]  (!%p1304_p12), %s1410_s5, 2048, %s240_s18, [#allocation6], %s1201_s8, %s1201_s8, %s1202_s9  }
  0x2b   : > { %267 = sbr.rel (%p1296_p10) target bundleno = 726 (0x2d6), region = 48  ;;  %p1418_p4 = scmp.eq.s32.totalorder (!%p1296_p10), %s1268_s28, 0 }
  0x30   : > { %1170 = dma.done.wait (%p1418_p4), [#allocation3], 1024   ;;  %p1419_p13 = pmov %p1418_p4 }
  0x31   : > { %p1420_p6 = pmov %p1418_p4 }
  0x32   : > { %1172 = vsyncadd (%p1419_p13), [#allocation3], 4294966272 }
  0x33   : > { %1174 = dma.done.wait (%p1420_p6), [#allocation6], 2048   ;;  %p1421_p9 = pmov %p1418_p4 }
  0x34   : > { %s853_s15 = sshll.u32 %s1268_s28, 2  ;;  %v1008_v0 = vld [vmem:[%s1406_s1] sm:$0xff]   ;;  %vm340_vm0 = vcmask 130048   ;;  %v1011_v3 = vld [vmem:[#allocation2 + $0x38] sm:$0xff]   ;;  %v1012_v4 = vld [vmem:[#allocation2 + $0x30] sm:$0xff]   ;;  %v1203_v42 = vmov 0   ;;  %v546_v58 = vlaneseq }
  0x35   : > { %1176 = vsyncadd (%p1421_p9), [#allocation6], 4294965248  ;;  %p304_p7 = scmp.lt.s32.totalorder %s853_s15, 7  ;;  %915 = vmatprep.subr.bf16.mxu1 %v1008_v0  ;;  %v1013_v5 = vld [vmem:[#allocation2 + $0x28] sm:$0xff]   ;;  %v1014_v6 = vld [vmem:[#allocation2 + $0x20] sm:$0xff]   ;;  %668 = vmatprep.mubr.bf16.mxu0 %v1203_v42  ;;  %s300_s17 = sand.u32 1, %s1187_s25  }
  0x36   : > { %916 = vmatpush3.bf16.msra.mxu1 %v1008_v0  ;;  %v1015_v7 = vld [vmem:[#allocation2 + $0x18] sm:$0xff]   ;;  %v1016_v8 = vld [vmem:[#allocation2 + $0x10] sm:$0xff]   ;;  %v1017_v9 = vld [vmem:[#allocation2 + $0x8] sm:$0xff]   ;;  %v547_v59 = vshrl.u32 %v546_v58, 7  ;;  %s901_s18 = sshll.u32 %s1268_s28, 10  ;;  %s1365_s22 = scalar_lea.sflag [#allocation4], %s300_s17 }
  0x37   : > { %s1428_s15 = smov (!%p304_p7, %s853_s15), 7  ;;  %921 = vmatprep.subr.bf16.mxu1 %v1011_v3  ;;  %v1018_v10 = vld [vmem:[#allocation2] sm:$0xff]   ;;  %v1019_v11 = vld [vmem:[#allocation5 + $0x74] ss:$8 sps:$4 sm:$0xff]   ;;  %v1021_v12 = vld [vmem:[#allocation5 + $0x70] ss:$8 sps:$4 sm:$0xff]   ;;  %s1359_s21 = scalar_lea.hbm %s1412_s7, %s901_s18 }
  0x38   : > { %s854_s16 = sshll.u32 %s1428_s15, 2  ;;  %v1022_v13 = vld [vmem:[#allocation5 + $0x64] ss:$8 sps:$4 sm:$0xff]   ;;  %636 = vmatprep.subr.bf16.mxu0 %v1019_v11  ;;  %v1024_v14 = vld [vmem:[#allocation5 + $0x60] ss:$8 sps:$4 sm:$0xff]   ;;  %v548_v60 = vsub.s32 0, %v547_v59 }
  0x39   : > { %s307_s19 = scalar_lea.vmem %s1405_s0, %s854_s16  ;;  %637 = vmatpush1.bf16.msra.mxu0 %v1021_v12  ;;  %v1025_v15 = vld [vmem:[#allocation5 + $0x54] ss:$8 sps:$4 sm:$0xff]   ;;  %v1027_v16 = vld [vmem:[#allocation5 + $0x50] ss:$8 sps:$4 sm:$0xff]   ;;  %v1028_v17 = vld [vmem:[#allocation5 + $0x44] ss:$8 sps:$4 sm:$0xff]  }
  0x3a   : > { %v1009_v1 = vld [vmem:[%s307_s19] sm:$0xff]   ;;  %v1010_v2 = vld [vmem:[%s307_s19 + $0x8] sm:$0xff]   ;;  %638 = vmatprep.subr.bf16.mxu0 %v1022_v13  ;;  %v1031_v19 = vld [vmem:[#allocation5 + $0x34] ss:$8 sps:$4 sm:$0xff]   ;;  %v552_v62 = vsub.s32 1, %v547_v59  ;;  %s852_s15 = sshll.u32 %s300_s17, 6 }
  0x3b   : > { %917 = vmatprep.mubr.msk.bf16.mxu1 %vm340_vm0, %v1009_v1  ;;  %v1030_v18 = vld [vmem:[#allocation5 + $0x40] ss:$8 sps:$4 sm:$0xff]   ;;  %v1033_v20 = vld [vmem:[#allocation5 + $0x30] ss:$8 sps:$4 sm:$0xff]   ;;  %v1034_v36 = vld [vmem:[#allocation5 + $0x24] ss:$8 sps:$4 sm:$0xff]  }
  0x3c   : > { %918 = vmatmul.mubr.msk.bf16.vlgmr.msra.gmra.mxu1 %vm340_vm0, %v1010_v2  ;;  %v855_v23 = vld [vmem:[%s1407_s2] ss:$0 sm:$0xff]  ;;  %v1037_v38 = vld [vmem:[#allocation5 + $0x14] ss:$8 sps:$4 sm:$0xff]   ;;  %v1039_v39 = vld [vmem:[#allocation5 + $0x10] ss:$8 sps:$4 sm:$0xff]  }
  0x3d   : > { %922 = vmatpush3.bf16.msra.mxu1 %v1011_v3  ;;  %639 = vmatpush1.bf16.msra.mxu0 %v1024_v14  ;;  %v1036_v37 = vld [vmem:[#allocation5 + $0x20] ss:$8 sps:$4 sm:$0xff]   ;;  %v1040_v40 = vld [vmem:[#allocation5 + $0x4] ss:$8 sps:$4 sm:$0xff]   ;;  %s302_s16 = scalar_lea.vmem [#allocation7], %s852_s15  ;;  %s1204_s23 = smov [#allocation7]  }
  0x3e   : > { %923 = vmatprep.subr.bf16.mxu1 %v1012_v4  ;;  %640 = vmatprep.subr.bf16.mxu0 %v1025_v15  ;;  %v1042_v41 = vld [vmem:[#allocation5] ss:$8 sps:$4 sm:$0xff]   ;;  %s760_s13 = sshll.u32 %s302_s16, 4  ;;  %s1131_s29 = sshll.u32 %s1204_s23, 4  ;;  %s1361_s13 = int_to_ptr.vmem [resolvable:$true] %s760_s13  ;;  %s1132_s29 = int_to_ptr.vmem [resolvable:$false] %s1131_s29 }
  0x3f   : > { %v861_v45 = vld [vmem:[%s1409_s4] ss:$0 sm:$0xff]  ;;  %s1127_s28 = scalar_lea.vmem %s1361_s13, 1024  ;;  %s1133_s8 = scalar_lea.vmem %s1132_s29, 2048 }
  0x40   : > { %v544_v61 = vld [vmem:[%s1411_s6] sm:$0x3]  ;;  %p1128_p10 = scmp.ne.s32.totalorder %s1361_s13, %s1127_s28  ;;  %p1134_p11 = scmp.lt.s32.totalorder %s1361_s13, %s1132_s29 }
  0x41   : > { %924 = vmatpush3.bf16.msra.mxu1 %v1012_v4  ;;  %641 = vmatpush1.bf16.msra.mxu0 %v1027_v16  ;;  %v549_v63 = vrot.slane %v544_v61, %v548_v60  ;;  %v553_v0 = vrot.slane %v544_v61, %v552_v62  ;;  %p1135_p0 = scmp.lt.s32.totalorder %s1133_s8, %s1127_s28 }
  0x42   : > { %925 = vmatprep.subr.bf16.mxu1 %v1013_v5  ;;  %642 = vmatprep.subr.bf16.mxu0 %v1028_v17  ;;  %p1129_p12 = pnand %p1128_p10, %p1285_p5 }
  0x43   : > { %p1136_p1 = por %p1135_p0, %p1134_p11 }
  0x44   : > { %p1130_p8 = pneg %p1129_p12 }
  0x45   : > { %926 = vmatpush3.bf16.msra.mxu1 %v1013_v5  ;;  %643 = vmatpush1.bf16.msra.mxu0 %v1030_v18 }
  0x46   : > { %927 = vmatprep.subr.bf16.mxu1 %v1014_v6  ;;  %644 = vmatprep.subr.bf16.mxu0 %v1031_v19  ;;  %p1137_p3 = pnand %p1136_p1, %p1130_p8 }
  0x49   : > { %928 = vmatpush3.bf16.msra.mxu1 %v1014_v6  ;;  %645 = vmatpush1.bf16.msra.mxu0 %v1033_v20 }
  0x4a   : > { %929 = vmatprep.subr.bf16.mxu1 %v1015_v7  ;;  %646 = vmatprep.subr.bf16.mxu0 %v1034_v36 }
  0x4d   : > { %930 = vmatpush3.bf16.msra.mxu1 %v1015_v7  ;;  %647 = vmatpush1.bf16.msra.mxu0 %v1036_v37 }
  0x4e   : > { %931 = vmatprep.subr.bf16.mxu1 %v1016_v8  ;;  %648 = vmatprep.subr.bf16.mxu0 %v1037_v38 }
  0x51   : > { %932 = vmatpush3.bf16.msra.mxu1 %v1016_v8  ;;  %649 = vmatpush1.bf16.msra.mxu0 %v1039_v39 }
  0x52   : > { %933 = vmatprep.subr.bf16.mxu1 %v1017_v9  ;;  %650 = vmatprep.subr.bf16.mxu0 %v1040_v40 }
  0x55   : > { %934 = vmatpush3.bf16.msra.mxu1 %v1017_v9  ;;  %651 = vmatpush1.bf16.msra.mxu0 %v1042_v41 }
  0x56   : > { %935 = vmatprep.subr.bf16.mxu1 %v1018_v10 }
  0x59   : > { %936 = vmatpush3.bf16.msra.mxu1 %v1018_v10 }
  0xfc   : > { %v919_v21 = vpop.f32.mrf.mxu1 }
  0xfd   : > { %v390_v27 = vadd.f32 %v919_v21, %v855_v23 }
  0xfe   : > { %v381_v22 = vpop.f32.mrf.mxu1 }
  0xff   : > { %v382_v25 = vadd.f32 %v855_v23, %v381_v22  ;;  %v398_v33 = vmax.f32 %v390_v27, 0.0 }
 0x100   : > { %v920_v24 = vpop.f32.mrf.mxu1 }
 0x101   : > { %v393_v26 = vadd.f32 %v920_v24, %v855_v23  ;;  %v396_v31 = vmax.f32 %v382_v25, 0.0 }
 0x102   : > { %v384_v28 = vpop.f32.mrf.mxu1 }
 0x103   : > { %v385_v29 = vadd.f32 %v855_v23, %v384_v28  ;;  %v399_v30 = vmax.f32 %v393_v26, 0.0 }
 0x105   : > { %v397_v32 = vmax.f32 %v385_v29, 0.0  ;;  %v401_v35 = vpack.c.bf16 %v399_v30, %v398_v33 }
 0x107   : > { %v400_v34 = vpack.c.bf16 %v397_v32, %v396_v31 }
 0x109   : > { %937 = vmatprep.mubr.bf16.mxu1 %v400_v34 }
 0x10a   : > { %938 = vmatmul.mubr.bf16.vlgmr.msra.gmra.mxu1 %v401_v35 }
 0x1ca   : > { %v939_v43 = vpop.f32.mrf.mxu1 }
 0x1cb   : > { %v516_v54 = vadd.f32 %v939_v43, %v861_v45 }
 0x1cc   : > { %v507_v44 = vpop.f32.mrf.mxu1 }
 0x1cd   : > { %v508_v47 = vadd.f32 %v861_v45, %v507_v44  ;;  %v524_v56 = vmax.f32 %v516_v54, 0.0 }
 0x1ce   : > { %v940_v46 = vpop.f32.mrf.mxu1 }
 0x1cf   : > { %v522_v50 = vmax.f32 %v508_v47, 0.0  ;;  %v519_v52 = vadd.f32 %v940_v46, %v861_v45 }
 0x1d0   : > { %v510_v48 = vpop.f32.mrf.mxu1 }
 0x1d1   : > { %v511_v49 = vadd.f32 %v861_v45, %v510_v48  ;;  %v525_v55 = vmax.f32 %v519_v52, 0.0 }
 0x1d3   : > { %v523_v51 = vmax.f32 %v511_v49, 0.0  ;;  %v527_v57 = vpack.c.bf16 %v525_v55, %v524_v56 }
 0x1d5   : > { %v526_v53 = vpack.c.bf16 %v523_v51, %v522_v50 }
 0x1d7   : > { %669 = vmatmul.mubr.bf16.vlgmr.msra.gmra.mxu0 %v526_v53 }
 0x1d8   : > { %678 = vmatprep.mubr.bf16.mxu0 %v1203_v42 }
 0x1df   : > { %679 = vmatmul.mubr.bf16.gmra.mxu0 %v527_v57 }
 0x297   : > { %v670_v1 = vpop.f32.mrf.mxu0 }
 0x298   : > { %v671_v2 = vadd.f32 %v670_v1, %v549_v63 }
 0x299   : > { %v672_v3 = vpop.f32.mrf.mxu0 }
 0x29a   : > { %v886_v4 = vmul.f32 -1.442695, %v671_v2  ;;  %v673_v5 = vadd.f32 %v672_v3, %v553_v0 }
 0x29b   : > { %v674_v6 = vpop.f32.mrf.mxu0 }
 0x29c   : > { %1043 = vpow2.f32 %v886_v4  ;;  %v887_v7 = vmul.f32 -1.442695, %v673_v5  ;;  %v675_v8 = vadd.f32 %v674_v6, %v549_v63 }
 0x29d   : > { %v676_v9 = vpop.f32.mrf.mxu0 }
 0x29e   : > { %1045 = vpow2.f32 %v887_v7  ;;  %v888_v10 = vmul.f32 -1.442695, %v675_v8  ;;  %v677_v11 = vadd.f32 %v676_v9, %v553_v0 }
 0x29f   : > { %v680_v12 = vpop.f32.mrf.mxu0 }
 0x2a0   : > { %1047 = vpow2.f32 %v888_v10  ;;  %v889_v13 = vmul.f32 -1.442695, %v677_v11  ;;  %v681_v14 = vadd.f32 %v680_v12, %v549_v63 }
 0x2a1   : > { %v682_v15 = vpop.f32.mrf.mxu0 }
 0x2a2   : > { %1049 = vpow2.f32 %v889_v13  ;;  %v890_v16 = vmul.f32 -1.442695, %v681_v14  ;;  %v683_v17 = vadd.f32 %v682_v15, %v553_v0 }
 0x2a3   : > { %v684_v18 = vpop.f32.mrf.mxu0 }
 0x2a4   : > { %1051 = vpow2.f32 %v890_v16  ;;  %v891_v19 = vmul.f32 -1.442695, %v683_v17  ;;  %v685_v20 = vadd.f32 %v684_v18, %v549_v63 }
 0x2a5   : > { %v686_v21 = vpop.f32.mrf.mxu0 }
 0x2a6   : > { %1053 = vpow2.f32 %v891_v19  ;;  %v892_v22 = vmul.f32 -1.442695, %v685_v20  ;;  %v687_v23 = vadd.f32 %v686_v21, %v553_v0 }
 0x2a8   : > { %1055 = vpow2.f32 %v892_v22  ;;  %v893_v24 = vmul.f32 -1.442695, %v687_v23 }
 0x2a9   : > { %v1044_v25 = vpop.eup %1043 }
 0x2aa   : > { %v713_v26 = vadd.f32 1.0, %v1044_v25  ;;  %1057 = vpow2.f32 %v893_v24 }
 0x2ab   : > { %v1046_v27 = vpop.eup %1045 }
 0x2ac   : > { %1059 = vrcp.f32 %v713_v26  ;;  %v714_v28 = vadd.f32 1.0, %v1046_v27 }
 0x2ad   : > { %v1048_v29 = vpop.eup %1047 }
 0x2ae   : > { %1061 = vrcp.f32 %v714_v28  ;;  %v715_v30 = vadd.f32 1.0, %v1048_v29 }
 0x2af   : > { %v1050_v31 = vpop.eup %1049 }
 0x2b0   : > { %1063 = vrcp.f32 %v715_v30  ;;  %v716_v32 = vadd.f32 1.0, %v1050_v31 }
 0x2b1   : > { %v1052_v33 = vpop.eup %1051 }
 0x2b2   : > { %1065 = vrcp.f32 %v716_v32  ;;  %v717_v34 = vadd.f32 1.0, %v1052_v33 }
 0x2b3   : > { %v1054_v35 = vpop.eup %1053 }
 0x2b4   : > { %1067 = vrcp.f32 %v717_v34  ;;  %v718_v36 = vadd.f32 1.0, %v1054_v35 }
 0x2b5   : > { %v1056_v37 = vpop.eup %1055 }
 0x2b6   : > { %1069 = vrcp.f32 %v718_v36  ;;  %v719_v38 = vadd.f32 1.0, %v1056_v37 }
 0x2b7   : > { %v1058_v39 = vpop.eup %1057 }
 0x2b8   : > { %1071 = vrcp.f32 %v719_v38  ;;  %v720_v40 = vadd.f32 1.0, %v1058_v39 }
 0x2b9   : > { %v1060_v41 = vpop.eup %1059 }
 0x2ba   : > { %737 = vst [vmem:[%s302_s16] sm:$0xff] %v1060_v41  ;;  %1073 = vrcp.f32 %v720_v40 }
 0x2bb   : > { %v1062_v42 = vpop.eup %1061 }
 0x2bc   : > { %738 = vst [vmem:[%s302_s16 + $0x8] sm:$0xff] %v1062_v42 }
 0x2bd   : > { %v1064_v43 = vpop.eup %1063 }
 0x2be   : > { %739 = vst [vmem:[%s302_s16 + $0x10] sm:$0xff] %v1064_v43 }
 0x2bf   : > { %v1066_v44 = vpop.eup %1065 }
 0x2c0   : > { %740 = vst [vmem:[%s302_s16 + $0x18] sm:$0xff] %v1066_v44 }
 0x2c1   : > { %v1068_v45 = vpop.eup %1067 }
 0x2c2   : > { %741 = vst [vmem:[%s302_s16 + $0x20] sm:$0xff] %v1068_v45 }
 0x2c3   : > { %v1070_v46 = vpop.eup %1069 }
 0x2c4   : > { %742 = vst [vmem:[%s302_s16 + $0x28] sm:$0xff] %v1070_v46 }
 0x2c5   : > { %v1072_v47 = vpop.eup %1071 }
 0x2c6   : > { %743 = vst [vmem:[%s302_s16 + $0x30] sm:$0xff] %v1072_v47 }
 0x2c7   : > { %v1074_v48 = vpop.eup %1073 }
 0x2c8   : > { %744 = vst [vmem:[%s302_s16 + $0x38] sm:$0xff] %v1074_v48 }
 0x2c9   : > { %1140 = shalt.err (!%p1137_p3)
}
 0x2ca   : > { %s1141_s9 = scalar_lea.hbm %s1359_s21, 1024  ;;  %s1145_s15 = scalar_lea.hbm %s1412_s7, 2048 }
 0x2cb   : > { %p1142_p2 = scmp.ne.s32.totalorder %s1359_s21, %s1141_s9  ;;  %p1146_p6 = scmp.lt.s32.totalorder %s1359_s21, %s1412_s7 }
 0x2cc   : > { %p1147_p9 = scmp.lt.s32.totalorder %s1145_s15, %s1141_s9 }
 0x2cd   : > { %p1143_p4 = pnand %p1142_p2, %p1285_p5 }
 0x2ce   : > { %p1148_p7 = por %p1147_p9, %p1146_p6 }
 0x2cf   : > { %p1144_p13 = pneg %p1143_p4 }
 0x2d1   : > { %p1149_p10 = pnand %p1148_p7, %p1144_p13 }
 0x2d3   : > { %1152 = shalt.err (!%p1149_p10)
}
 0x2d4   : > { %s1205_s19 = smov 256   ;;  %s1206_s20 = smov 16  }
 0x2d5   : > { %949 = dma.vmem_to_hbm [thread:$0]  (%p1285_p5), %s1361_s13, 1024, %s1359_s21, %s1365_s22, %s1205_s19, %s1205_s19, %s1206_s20  }
 0x2d6 PF: > { %p966_p12 = scmp.ge.s32.totalorder %s1195_s27, 2  ;;  %s775_s28 = sand.u32 1, %s1183_s24  }
 0x2d7   : > { %p1422_p8 = scmp.ne.s32.totalorder %s1415_s12, 0  ;;  %s776_s23 = scalar_lea.sflag [#allocation4], %s775_s28 }
 0x2d9   : > { %p959_p11 = pnand %p966_p12, %p1422_p8 }
 0x2db   : > { %p960_p0 = pneg %p959_p11 }
 0x2dd   : > { %1178 = dma.done.wait (%p960_p0), %s776_s23, 1024  }
 0x2de   : > { %1180 = vsyncadd (%p960_p0), %s776_s23, 4294966272  ;;  %p19_p1 = scmp.ge.s32.totalorder %s1272_s30, 4   ;;  %s1423_s24 = smov %s1187_s25 }
 0x2df   : > { %s1424_s25 = smov %s1191_s26  ;;  %s1425_s26 = smov %s1283_s10 }
 0x2e0   : > { %s1426_s27 = smov %s1272_s30  ;;  %21 = sbr.rel (!%p19_p1) target bundleno = 5 (0x5), region = 92 }
 0x2e5   :  { %781 = vsyncpa [#allocation3], 1 }
 0x2e6   :  { %783 = vsyncpa [#allocation3 + $0x1], 1 }
 0x2e7   :  { %784 = vsyncpa [#allocation6], 1 }
 0x2e8   :  { %785 = vsyncpa [#allocation4], 1 }
 0x2e9   :  { %787 = vsyncpa [#allocation4 + $0x1], 1 }

</bundles_post_ra>
